<compile_context>
chip_gen: v6e
topology: v6e:2x2x1
jax: 0.10.0
libtpu: 0.0.40
codegen_flags: <defaults>
</compile_context>

<pallas_src>
import jax
import jax.numpy as jnp
from jax.experimental import pallas as pl
from jax.experimental.pallas import tpu as pltpu


def _round_up(x, m):
    return (x + m - 1) // m * m


# --------------------------------------------------------------------------
# Kernel: fused  relu(x@w1 + sh1) -> relu(.@w2 + sh2) -> relu(.@w3 + b3)
# --------------------------------------------------------------------------
def _mlp_kernel(x_ref, w1_ref, sh1_ref, w2_ref, sh2_ref, w3_ref, b3_ref, o_ref):
    # x streamed as f32; cast to bf16 in-kernel (VPU) for the MXU.
    x = x_ref[...].astype(jnp.bfloat16)                               # (tb, D)

    # fc1 (+folded bn1) + relu  -- bf16 MXU matmul, f32 accumulate/elementwise
    h1 = jnp.dot(x, w1_ref[...], preferred_element_type=jnp.float32) + sh1_ref[...]
    h1 = jnp.maximum(h1, 0.0).astype(jnp.bfloat16)                    # (tb, 512)

    # dropout (eval mode) is identity.
    # TODO(synk): training-mode dropout (p=0.4) via pltpu.prng_random_bits not implemented.

    # fc2 (+folded bn2) + relu  -- H2 padded to 128 lanes (padded cols are 0,
    # relu keeps them 0, padded w3 rows are 0 => no leakage into fc3).
    h2 = jnp.dot(h1, w2_ref[...], preferred_element_type=jnp.float32) + sh2_ref[...]
    h2 = jnp.maximum(h2, 0.0).astype(jnp.bfloat16)                    # (tb, 128)

    # fc3 + relu, lane-dense 128-column output block, bf16 writeback.
    h3 = jnp.dot(h2, w3_ref[...], preferred_element_type=jnp.float32) + b3_ref[...]
    o_ref[...] = jnp.maximum(h3, 0.0).astype(o_ref.dtype)             # (tb, C_pad)


# --------------------------------------------------------------------------
# Wrapper
# --------------------------------------------------------------------------
def mlp_forward(x, folded_params, num_cls, *, block_b=None):
    """x: (B, 1, input_dim) -> (B, num_cls) float32."""
    w1, sh1, w2, sh2, w3, b3 = folded_params
    B = x.shape[0]
    D = x.shape[-1]
    H1 = w1.shape[1]          # 512
    H2p = w2.shape[1]         # 32 padded to 128
    C_pad = w3.shape[1]       # num_cls padded to a multiple of 128

    # fc1(x).squeeze(1) == fc1(squeeze(x, 1)); keep f32 (cast done in-kernel).
    x2d = x.reshape(B, D)

    # Batch tiling:
    #  - small B: whole batch in one grid step (kernel is per-step-overhead bound)
    #  - large B: big tiles (<=1024 rows) to amortize the ~0.35us/step cost,
    #    while keeping grid >= 2 so v7x can shard the batch across both TCs.
    if block_b is None:
        if B <= 512:
            block_b = _round_up(B, 16)
        else:
            block_b = min(1024, _round_up(-(-B // 2), 16))
    B_pad = _round_up(B, block_b)
    if B_pad != B:
        x2d = jnp.pad(x2d, ((0, B_pad - B), (0, 0)))

    grid = (B_pad // block_b,)

    def full(shape):
        # Grid-invariant operands (weights / shifts); constant index_map so the
        # pipeline fetches them once.  (Buffered(1) would drop the dead second
        # buffer, but at ~100 KB total it is negligible here.)
        return pl.BlockSpec(shape, lambda i: (0, 0))

    flops = 2 * B_pad * (D * H1 + H1 * H2p + H2p * C_pad)
    bytes_accessed = (
        int(x2d.size) * x2d.dtype.itemsize
        + B_pad * C_pad * 2                                     # bf16 output
        + sum(int(a.size) * a.dtype.itemsize for a in (w1, sh1, w2, sh2, w3, b3)))

    out = pl.pallas_call(
        _mlp_kernel,
        out_shape=jax.ShapeDtypeStruct((B_pad, C_pad), jnp.bfloat16),
        grid_spec=pltpu.PrefetchScalarGridSpec(
            num_scalar_prefetch=0,
            grid=grid,
            in_specs=[
                pl.BlockSpec((block_b, D), lambda i: (i, 0)),   # x tile (only streamed operand)
                full((D, H1)), full((1, H1)),                   # w1', shift1
                full((H1, H2p)), full((1, H2p)),                # w2' (padded), shift2 (padded)
                full((H2p, C_pad)), full((1, C_pad)),           # w3 (padded), b3 (padded)
            ],
            out_specs=pl.BlockSpec((block_b, C_pad), lambda i: (i, 0)),
        ),
        compiler_params=pltpu.CompilerParams(
            dimension_semantics=("parallel",)),
        cost_estimate=pl.CostEstimate(
            flops=flops, transcendentals=0, bytes_accessed=bytes_accessed),
    )(x2d, w1, sh1, w2, sh2, w3, b3)

    # Slice away batch/lane padding; upcast the bf16 writeback to f32.
    return out[:B, :num_cls].astype(jnp.float32)


# --------------------------------------------------------------------------
# Parameter construction (synthetic, PyTorch-Linear-like init) and one-time
# folding/padding/packing for the kernel.
# --------------------------------------------------------------------------
def make_params(key, input_dim, num_cls, k=32):
    """Raw params: Linear weights stored as (in, out), BN folded to scale/shift."""
    ks = jax.random.split(key, 14)
    eps = 1e-5

    def linear(kw, kb, fan_in, fan_out):
        bound = 1.0 / jnp.sqrt(fan_in)
        w = jax.random.uniform(kw, (fan_in, fan_out), jnp.float32, -bound, bound)
        b = jax.random.uniform(kb, (1, fan_out), jnp.float32, -bound, bound)
        return w, b

    w1, b1 = linear(ks[0], ks[1], input_dim, 512)
    w2, b2 = linear(ks[2], ks[3], 512, k)
    w3, b3 = linear(ks[4], ks[5], k, num_cls)

    def bn(kg, kb, km, kv, n):
        gamma = 1.0 + 0.1 * jax.random.normal(kg, (1, n), jnp.float32)
        beta = 0.1 * jax.random.normal(kb, (1, n), jnp.float32)
        mean = 0.1 * jax.random.normal(km, (1, n), jnp.float32)
        var = jnp.abs(jax.random.normal(kv, (1, n), jnp.float32)) + 0.5
        scale = gamma / jnp.sqrt(var + eps)          # BN (eval) -> per-feature scale/shift
        shift = beta - mean * scale
        return scale, shift

    s1, t1 = bn(ks[6], ks[7], ks[8], ks[9], 512)
    s2, t2 = bn(ks[10], ks[11], ks[12], ks[13], k)
    return (w1, b1, s1, t1, w2, b2, s2, t2, w3, b3)


def prepare_params(raw_params, *, compute_dtype=jnp.bfloat16, lane=128):
    """One-time prep: fold bias+BN into weights/shifts, zero-pad the 32-wide
    hidden and the fc3 output columns to lane-dense multiples of 128, cast
    matmul operands to the MXU compute dtype.  Accuracy is bf16-weight-limited."""
    (w1, b1, s1, t1, w2, b2, s2, t2, w3, b3) = raw_params

    w1f = (w1 * s1).astype(compute_dtype)
    sh1 = (b1 * s1 + t1).astype(jnp.float32)

    H2 = w2.shape[1]
    H2p = _round_up(H2, lane)
    # Padded columns/entries are exactly zero -> relu keeps them zero.
    w2f = jnp.zeros((w2.shape[0], H2p), compute_dtype).at[:, :H2].set(
        (w2 * s2).astype(compute_dtype))
    sh2 = jnp.zeros((1, H2p), jnp.float32).at[:, :H2].set(b2 * s2 + t2)

    C = w3.shape[1]
    C_pad = _round_up(C, lane)
    # Padded w3 rows are exactly zero -> padded h2 lanes cannot leak into fc3.
    w3p = jnp.zeros((H2p, C_pad), compute_dtype).at[:H2, :C].set(
        w3.astype(compute_dtype))
    b3p = jnp.zeros((1, C_pad), jnp.float32).at[:, :C].set(b3)

    return (w1f, sh1, w2f, sh2, w3p, b3p)


# --------------------------------------------------------------------------
# References
# --------------------------------------------------------------------------
def reference_forward_f32(x, raw_params):
    """Pure-f32 reference with the original (unfolded) parameters."""
    (w1, b1, s1, t1, w2, b2, s2, t2, w3, b3) = raw_params
    x2d = x.reshape(x.shape[0], x.shape[-1])
    h1 = jnp.maximum((x2d @ w1 + b1) * s1 + t1, 0.0)
    h2 = jnp.maximum((h1 @ w2 + b2) * s2 + t2, 0.0)
    return jnp.maximum(h2 @ w3 + b3, 0.0)


def reference_forward_folded(x, folded_params, num_cls):
    """Pure-JAX reference matching the kernel's folded/padded bf16 math."""
    w1, sh1, w2, sh2, w3, b3 = folded_params
    x2d = x.reshape(x.shape[0], x.shape[-1]).astype(jnp.bfloat16)
    h1 = jnp.maximum(jnp.dot(x2d, w1, preferred_element_type=jnp.float32) + sh1, 0.0)
    h1 = h1.astype(jnp.bfloat16)
    h2 = jnp.maximum(jnp.dot(h1, w2, preferred_element_type=jnp.float32) + sh2, 0.0)
    h2 = h2.astype(jnp.bfloat16)
    h3 = jnp.maximum(jnp.dot(h2, w3, preferred_element_type=jnp.float32) + b3, 0.0)
    return h3[:, :num_cls].astype(jnp.bfloat16).astype(jnp.float32)


if __name__ == "__main__":
    B, input_dim, num_cls = 16, 64, 10
    key = jax.random.PRNGKey(0)
    kx, kp = jax.random.split(key)

    x = jax.random.normal(kx, (B, 1, input_dim), jnp.float32)
    raw_params = make_params(kp, input_dim, num_cls)
    folded_params = prepare_params(raw_params)      # one-time fold/pad/cast

    out = mlp_forward(x, folded_params, num_cls)
    out = jax.block_until_ready(out)

    assert out.shape == (B, num_cls)
    ref_bf = reference_forward_folded(x, folded_params, num_cls)
    ref_f32 = reference_forward_f32(x, raw_params)
    assert jnp.allclose(out, ref_bf, atol=1e-2, rtol=1e-2), "mismatch vs folded bf16 reference"
    assert jnp.allclose(out, ref_f32, atol=5e-2, rtol=5e-2), "mismatch vs f32 reference"
    print("KERNEL_OK")
</pallas_src>

<mosaic_0001>
module attributes {stable_mosaic.version = 11 : i64} {
  func.func @_mlp_kernel(%arg0: i32, %arg1: memref<16x64xf32, #tpu.memory_space<vmem>>, %arg2: memref<64x512xbf16, #tpu.memory_space<vmem>>, %arg3: memref<1x512xf32, #tpu.memory_space<vmem>>, %arg4: memref<512x128xbf16, #tpu.memory_space<vmem>>, %arg5: memref<1x128xf32, #tpu.memory_space<vmem>>, %arg6: memref<128x128xbf16, #tpu.memory_space<vmem>>, %arg7: memref<1x128xf32, #tpu.memory_space<vmem>>, %arg8: memref<16x128xbf16, #tpu.memory_space<vmem>>) attributes {dimension_semantics = [#tpu.dimension_semantics<parallel>], iteration_bounds = array<i64: 1>, scalar_prefetch = 0 : i64, scratch_operands = 0 : i64, tpu.core_type = #tpu.core_type<tc>, window_params = [{transform_indices = @transform_0, window_bounds = array<i64: 16, 64>}, {pipeline_mode = #tpu.pipeline_mode<synchronous>, transform_indices = @transform_1, window_bounds = array<i64: 64, 512>}, {pipeline_mode = #tpu.pipeline_mode<synchronous>, transform_indices = @transform_2, window_bounds = array<i64: 1, 512>}, {pipeline_mode = #tpu.pipeline_mode<synchronous>, transform_indices = @transform_3, window_bounds = array<i64: 512, 128>}, {pipeline_mode = #tpu.pipeline_mode<synchronous>, transform_indices = @transform_4, window_bounds = array<i64: 1, 128>}, {pipeline_mode = #tpu.pipeline_mode<synchronous>, transform_indices = @transform_5, window_bounds = array<i64: 128, 128>}, {pipeline_mode = #tpu.pipeline_mode<synchronous>, transform_indices = @transform_6, window_bounds = array<i64: 1, 128>}, {transform_indices = @transform_7, window_bounds = array<i64: 16, 128>}]} {
    %c0 = arith.constant 0 : index
    %c0_0 = arith.constant 0 : index
    %0 = vector.load %arg1[%c0, %c0_0] : memref<16x64xf32, #tpu.memory_space<vmem>>, vector<16x64xf32>
    %1 = arith.truncf %0 : vector<16x64xf32> to vector<16x64xbf16>
    %c0_1 = arith.constant 0 : index
    %c0_2 = arith.constant 0 : index
    %2 = vector.load %arg2[%c0_1, %c0_2] : memref<64x512xbf16, #tpu.memory_space<vmem>>, vector<64x512xbf16>
    %cst = arith.constant dense<0.000000e+00> : vector<16x512xf32>
    %3 = tpu.matmul %1, %2, %cst {dimension_numbers = #tpu.dot_dimension_numbers<[1], [0], [0], [1], [0, 0, 1, 1], [], []>} : vector<16x64xbf16>, vector<64x512xbf16>, vector<16x512xf32> -> vector<16x512xf32>
    %c0_3 = arith.constant 0 : index
    %c0_4 = arith.constant 0 : index
    %4 = vector.load %arg3[%c0_3, %c0_4] : memref<1x512xf32, #tpu.memory_space<vmem>>, vector<1x512xf32>
    %5 = vector.broadcast %4 : vector<1x512xf32> to vector<16x512xf32>
    %6 = arith.addf %3, %5 : vector<16x512xf32>
    %cst_5 = arith.constant 0.000000e+00 : f32
    %7 = vector.broadcast %cst_5 : f32 to vector<16x512xf32>
    %8 = arith.maximumf %6, %7 : vector<16x512xf32>
    %9 = arith.truncf %8 : vector<16x512xf32> to vector<16x512xbf16>
    %c0_6 = arith.constant 0 : index
    %c0_7 = arith.constant 0 : index
    %10 = vector.load %arg4[%c0_6, %c0_7] : memref<512x128xbf16, #tpu.memory_space<vmem>>, vector<512x128xbf16>
    %cst_8 = arith.constant dense<0.000000e+00> : vector<16x128xf32>
    %11 = tpu.matmul %9, %10, %cst_8 {dimension_numbers = #tpu.dot_dimension_numbers<[1], [0], [0], [1], [0, 0, 1, 1], [], []>} : vector<16x512xbf16>, vector<512x128xbf16>, vector<16x128xf32> -> vector<16x128xf32>
    %c0_9 = arith.constant 0 : index
    %c0_10 = arith.constant 0 : index
    %12 = vector.load %arg5[%c0_9, %c0_10] : memref<1x128xf32, #tpu.memory_space<vmem>>, vector<1x128xf32>
    %13 = vector.broadcast %12 : vector<1x128xf32> to vector<16x128xf32>
    %14 = arith.addf %11, %13 : vector<16x128xf32>
    %cst_11 = arith.constant 0.000000e+00 : f32
    %15 = vector.broadcast %cst_11 : f32 to vector<16x128xf32>
    %16 = arith.maximumf %14, %15 : vector<16x128xf32>
    %17 = arith.truncf %16 : vector<16x128xf32> to vector<16x128xbf16>
    %c0_12 = arith.constant 0 : index
    %c0_13 = arith.constant 0 : index
    %18 = vector.load %arg6[%c0_12, %c0_13] : memref<128x128xbf16, #tpu.memory_space<vmem>>, vector<128x128xbf16>
    %cst_14 = arith.constant dense<0.000000e+00> : vector<16x128xf32>
    %19 = tpu.matmul %17, %18, %cst_14 {dimension_numbers = #tpu.dot_dimension_numbers<[1], [0], [0], [1], [0, 0, 1, 1], [], []>} : vector<16x128xbf16>, vector<128x128xbf16>, vector<16x128xf32> -> vector<16x128xf32>
    %c0_15 = arith.constant 0 : index
    %c0_16 = arith.constant 0 : index
    %20 = vector.load %arg7[%c0_15, %c0_16] : memref<1x128xf32, #tpu.memory_space<vmem>>, vector<1x128xf32>
    %21 = vector.broadcast %20 : vector<1x128xf32> to vector<16x128xf32>
    %22 = arith.addf %19, %21 : vector<16x128xf32>
    %cst_17 = arith.constant 0.000000e+00 : f32
    %23 = vector.broadcast %cst_17 : f32 to vector<16x128xf32>
    %24 = arith.maximumf %22, %23 : vector<16x128xf32>
    %25 = arith.truncf %24 : vector<16x128xf32> to vector<16x128xbf16>
    %c0_18 = arith.constant 0 : index
    %c0_19 = arith.constant 0 : index
    %26 = vector.load %arg8[%c0_18, %c0_19] : memref<16x128xbf16, #tpu.memory_space<vmem>>, vector<16x128xbf16>
    tpu.vector_store %arg8[%c0_18, %c0_19], %25 {strides = array<i32>} : memref<16x128xbf16, #tpu.memory_space<vmem>>, vector<16x128xbf16>,
    return
  }
  func.func @transform_0(%arg0: i32) -> (i32, i32) {
    %c0_i32 = arith.constant 0 : i32
    %c0_i32_0 = arith.constant 0 : i32
    return %arg0, %c0_i32 : i32, i32
  }
  func.func @transform_1(%arg0: i32) -> (i32, i32) {
    %c0_i32 = arith.constant 0 : i32
    %c0_i32_0 = arith.constant 0 : i32
    %c0_i32_1 = arith.constant 0 : i32
    return %c0_i32, %c0_i32_0 : i32, i32
  }
  func.func @transform_2(%arg0: i32) -> (i32, i32) {
    %c0_i32 = arith.constant 0 : i32
    %c0_i32_0 = arith.constant 0 : i32
    %c0_i32_1 = arith.constant 0 : i32
    return %c0_i32, %c0_i32_0 : i32, i32
  }
  func.func @transform_3(%arg0: i32) -> (i32, i32) {
    %c0_i32 = arith.constant 0 : i32
    %c0_i32_0 = arith.constant 0 : i32
    %c0_i32_1 = arith.constant 0 : i32
    return %c0_i32, %c0_i32_0 : i32, i32
  }
  func.func @transform_4(%arg0: i32) -> (i32, i32) {
    %c0_i32 = arith.constant 0 : i32
    %c0_i32_0 = arith.constant 0 : i32
    %c0_i32_1 = arith.constant 0 : i32
    return %c0_i32, %c0_i32_0 : i32, i32
  }
  func.func @transform_5(%arg0: i32) -> (i32, i32) {
    %c0_i32 = arith.constant 0 : i32
    %c0_i32_0 = arith.constant 0 : i32
    %c0_i32_1 = arith.constant 0 : i32
    return %c0_i32, %c0_i32_0 : i32, i32
  }
  func.func @transform_6(%arg0: i32) -> (i32, i32) {
    %c0_i32 = arith.constant 0 : i32
    %c0_i32_0 = arith.constant 0 : i32
    %c0_i32_1 = arith.constant 0 : i32
    return %c0_i32, %c0_i32_0 : i32, i32
  }
  func.func @transform_7(%arg0: i32) -> (i32, i32) {
    %c0_i32 = arith.constant 0 : i32
    %c0_i32_0 = arith.constant 0 : i32
    return %arg0, %c0_i32 : i32, i32
  }
}

</mosaic_0001>

<bundles_post_ra>
// kernel: tpu_custom_call.1
= control target key start
LH: loop header
LB: loop body
LE: loop exit
PB: predicated region body
PF: predicated region fallthrough
CT: control target
= control target key end

     0   :  { %12 = vsyncpa [#allocation3], 0  ;;  %s1256_s0 = inlined_call_operand.hbm [shape: f32[16,64], index: 0, kind: input, shape index: {}]   ;;  %s1257_s1 = inlined_call_operand.hbm [shape: bf16[64,512], index: 1, kind: input, shape index: {}]   ;;  %s1258_s2 = inlined_call_operand.hbm [shape: f32[1,512], index: 2, kind: input, shape index: {}]   ;;  %s1259_s3 = inlined_call_operand.hbm [shape: bf16[512,128], index: 3, kind: input, shape index: {}]   ;;  %s1260_s4 = inlined_call_operand.vmem [shape: f32[1,128], index: 4, kind: input, shape index: {}]   ;;  %s1261_s5 = inlined_call_operand.hbm [shape: bf16[128,128], index: 5, kind: input, shape index: {}]   ;;  %s1262_s6 = inlined_call_operand.vmem [shape: f32[1,128], index: 6, kind: input, shape index: {}]   ;;  %s1263_s7 = inlined_call_operand.hbm [shape: bf16[16,128], index: 7, kind: output, shape index: {}]  }
   0x1   :  { %13 = vsyncpa [#allocation6], 0 }
   0x2   :  { %14 = vsyncpa [#allocation9], 0 }
   0x3   :  { %15 = vsyncpa [#allocation4], 0  ;;  %s1157_s24 = smov [#allocation5]  }
   0x4   :  { %s33_s25 = sshll.u32 %s1157_s24, 4  ;;  %s34_s25 = int_to_ptr.vmem [resolvable:$true] %s33_s25 }
   0x5   :  { %s1037_s26 = scalar_lea.vmem %s34_s25, 2048  ;;  %p1042_p1 = scmp.lt.s32.totalorder %s34_s25, %s34_s25 }
   0x6   :  { %p1038_p0 = scmp.ne.s32.totalorder %s34_s25, %s1037_s26  ;;  %p1043_p2 = scmp.lt.s32.totalorder %s1037_s26, %s1037_s26 }
   0x8   :  { %p1044_p3 = por %p1043_p2, %p1042_p1 }
   0xa   :  { %p1045_p4 = pnand %p1044_p3, %p1038_p0 }
   0xc   :  { %1048 = shalt.err (!%p1045_p4)
}
   0xd   :  { %s1158_s27 = smov 256   ;;  %s1159_s28 = smov 16  }
   0xe   :  { %39 = dma.hbm_to_vmem [thread:$0]  %s1257_s1, 2048, %s34_s25, [#allocation6], %s1158_s27, %s1158_s27, %s1159_s28  }
   0xf   :  { %s1160_s8 = smov [#allocation8]  }
  0x10   :  { %s55_s9 = sshll.u32 %s1160_s8, 4  ;;  %s56_s9 = int_to_ptr.vmem [resolvable:$true] %s55_s9 }
  0x11   :  { %s1057_s10 = scalar_lea.vmem %s56_s9, 4096  ;;  %p1062_p6 = scmp.lt.s32.totalorder %s56_s9, %s56_s9 }
  0x12   :  { %p1058_p5 = scmp.ne.s32.totalorder %s56_s9, %s1057_s10  ;;  %p1063_p7 = scmp.lt.s32.totalorder %s1057_s10, %s1057_s10 }
  0x14   :  { %p1064_p8 = por %p1063_p7, %p1062_p6 }
  0x16   :  { %p1065_p9 = pnand %p1064_p8, %p1058_p5 }
  0x18   :  { %1068 = shalt.err (!%p1065_p9)
}
  0x19   :  { %s1161_s11 = smov 64   ;;  %s1162_s12 = smov 4  }
  0x1a   :  { %61 = dma.hbm_to_vmem [thread:$0]  %s1259_s3, 4096, %s56_s9, [#allocation9], %s1161_s11, %s1161_s11, %s1162_s12  }
  0x1b   :  { %s1163_s1 = smov [#allocation2]  }
  0x1c   :  { %s21_s15 = sshll.u32 %s1163_s1, 4  ;;  %s22_s15 = int_to_ptr.vmem [resolvable:$true] %s21_s15 }
  0x1d   :  { %s1077_s16 = scalar_lea.vmem %s22_s15, 256  ;;  %p1082_p11 = scmp.lt.s32.totalorder %s22_s15, %s22_s15 }
  0x1e   :  { %p1078_p10 = scmp.ne.s32.totalorder %s22_s15, %s1077_s16  ;;  %p1083_p12 = scmp.lt.s32.totalorder %s1077_s16, %s1077_s16 }
  0x20   :  { %p1084_p13 = por %p1083_p12, %p1082_p11 }
  0x22   :  { %p1085_p0 = pnand %p1084_p13, %p1078_p10 }
  0x24   :  { %1088 = shalt.err (!%p1085_p0)
}
  0x25   :  { %s1164_s17 = smov 128   ;;  %s1165_s18 = smov 8  }
  0x26   :  { %27 = dma.hbm_to_vmem [thread:$0]  %s1256_s0, 256, %s22_s15, [#allocation3], %s1164_s17, %s1164_s17, %s1165_s18  }
  0x27   :  { %s1166_s21 = smov [#allocation7]   ;;  %s1167_s3 = smov [#allocation10]  }
  0x28   :  { %s46_s22 = sshll.u32 %s1166_s21, 4  ;;  %s69_s23 = sshll.u32 %s1167_s3, 4  ;;  %s47_s22 = int_to_ptr.vmem [resolvable:$true] %s46_s22  ;;  %s70_s23 = int_to_ptr.vmem [resolvable:$true] %s69_s23 }
  0x29   :  { %s1097_s24 = scalar_lea.vmem %s47_s22, 64  ;;  %p1102_p2 = scmp.lt.s32.totalorder %s47_s22, %s47_s22 }
  0x2a   :  { %p1098_p1 = scmp.ne.s32.totalorder %s47_s22, %s1097_s24  ;;  %p1103_p3 = scmp.lt.s32.totalorder %s1097_s24, %s1097_s24 }
  0x2c   :  { %p1104_p4 = por %p1103_p3, %p1102_p2 }
  0x2e   :  { %p1105_p5 = pnand %p1104_p4, %p1098_p1 }
  0x30   :  { %1108 = shalt.err (!%p1105_p5)
}
  0x31   :  { %49 = dma.hbm_to_vmem [thread:$0]  %s1258_s2, 64, %s47_s22, [#allocation6]  }
  0x32   :  { %s1117_s27 = scalar_lea.vmem %s70_s23, 1024  ;;  %p1122_p7 = scmp.lt.s32.totalorder %s70_s23, %s70_s23 }
  0x33   :  { %p1118_p6 = scmp.ne.s32.totalorder %s70_s23, %s1117_s27  ;;  %p1123_p8 = scmp.lt.s32.totalorder %s1117_s27, %s1117_s27 }
  0x35   :  { %p1124_p9 = por %p1123_p8, %p1122_p7 }
  0x37   :  { %p1125_p10 = pnand %p1124_p9, %p1118_p6 }
  0x39   :  { %1128 = shalt.err (!%p1125_p10)
}
  0x3a   :  { %75 = dma.hbm_to_vmem [thread:$0]  %s1261_s5, 1024, %s70_s23, [#allocation9], %s1161_s11, %s1161_s11, %s1162_s12  }
  0x3b   :  { %1149 = dma.done.wait [#allocation3], 256  }
  0x3c   :  { %1150 = vsyncadd [#allocation3], 4294967040 }
  0x3d   :  { %1151 = dma.done.wait [#allocation6], 2112  }
  0x3e   :  { %1152 = vsyncadd [#allocation6], 4294965184 }
  0x3f   :  { %1153 = dma.done.wait [#allocation9], 5120  }
  0x40   :  { %1154 = vsyncadd [#allocation9], 4294962176  ;;  %v1168_v0 = vmov 0   ;;  %v965_v1 = vld [vmem:[#allocation5 + $0x64] ss:$16 sps:$4 sm:$0xff]   ;;  %v95_v10 = vld [vmem:[#allocation2 + $0x8] sm:$0xff]  ;;  %v115_v53 = vlaneseq }
  0x41   :  { %251 = vmatprep.mubr.bf16.mxu1 %v1168_v0  ;;  %v967_v2 = vld [vmem:[#allocation5 + $0x60] ss:$16 sps:$4 sm:$0xff]   ;;  %227 = vmatprep.subr.bf16.mxu1 %v965_v1  ;;  %v968_v3 = vld [vmem:[#allocation5 + $0x44] ss:$16 sps:$4 sm:$0xff]   ;;  %v979_v11 = vld [vmem:[#allocation5 + $0x6c] ss:$16 sps:$4 sm:$0xff]  }
  0x42   :  { %228 = vmatpush1.bf16.msra.mxu1 %v967_v2  ;;  %v970_v4 = vld [vmem:[#allocation5 + $0x40] ss:$16 sps:$4 sm:$0xff]   ;;  %v971_v5 = vld [vmem:[#allocation5 + $0x24] ss:$16 sps:$4 sm:$0xff]   ;;  %v977_v13 = vld [vmem:[#allocation5 + $0x68] ss:$16 sps:$4 sm:$0xff]  }
  0x43   :  { %229 = vmatprep.subr.bf16.mxu1 %v968_v3  ;;  %v973_v6 = vld [vmem:[#allocation5 + $0x20] ss:$16 sps:$4 sm:$0xff]   ;;  %v974_v7 = vld [vmem:[#allocation5 + $0x4] ss:$16 sps:$4 sm:$0xff]   ;;  %vm215_vm0 = vcmask 523264   ;;  %v1169_v52 = vmov 0.0  }
  0x44   :  { %v976_v8 = vld [vmem:[#allocation5] ss:$16 sps:$4 sm:$0xff]   ;;  %v991_v16 = vld [vmem:[#allocation8 + $0x70] sm:$0xff]   ;;  %v982_v17 = vld [vmem:[#allocation5 + $0x4c] ss:$16 sps:$4 sm:$0xff]   ;;  %v116_v54 = vshrl.u32 %v115_v53, 7 }
  0x45   :  { %v94_v9 = vld [vmem:[#allocation2] sm:$0xff]  ;;  %v989_v12 = vld [vmem:[#allocation8 + $0x78] sm:$0xff]   ;;  %v980_v20 = vld [vmem:[#allocation5 + $0x48] ss:$16 sps:$4 sm:$0xff]   ;;  %vm1170_vm1 = vmmov 0  }
  0x46   :  { %230 = vmatpush1.bf16.msra.mxu1 %v970_v4  ;;  %v990_v14 = vld [vmem:[#allocation8 + $0x38] sm:$0xff]   ;;  %v96_v15 = vpack.c.bf16 %v95_v10, %v94_v9  ;;  %877 = vmatprep.subr.bf16.mxu0 %v989_v12  ;;  %v992_v18 = vld [vmem:[#allocation8 + $0x30] sm:$0xff]   ;;  %v993_v19 = vld [vmem:[#allocation8 + $0x68] sm:$0xff]   ;;  %v121_v55 = vsub.s32 1, %v116_v54  ;;  %v117_v57 = vsub.s32 0, %v116_v54  ;;  %v129_v10 = vsub.s32 3, %v116_v54 }
  0x47   :  { %231 = vmatprep.subr.bf16.mxu1 %v971_v5  ;;  %878 = vmatpush3.bf16.msra.mxu0 %v990_v14  ;;  %v985_v21 = vld [vmem:[#allocation5 + $0x2c] ss:$16 sps:$4 sm:$0xff]   ;;  %v983_v23 = vld [vmem:[#allocation5 + $0x28] ss:$16 sps:$4 sm:$0xff]   ;;  %v113_v56 = vld [vmem:[#allocation7] sm:$0xf] }
  0x48   :  { %879 = vmatprep.subr.bf16.mxu0 %v991_v16  ;;  %v994_v22 = vld [vmem:[#allocation8 + $0x28] sm:$0xff]   ;;  %v995_v24 = vld [vmem:[#allocation8 + $0x60] sm:$0xff]   ;;  %v997_v27 = vld [vmem:[#allocation8 + $0x58] sm:$0xff]   ;;  %v122_v59 = vrot.slane %v113_v56, %v121_v55  ;;  %v118_v60 = vrot.slane %v113_v56, %v117_v57 }
  0x49   :  { %v988_v25 = vld [vmem:[#allocation5 + $0xc] ss:$16 sps:$4 sm:$0xff]   ;;  %v996_v26 = vld [vmem:[#allocation8 + $0x20] sm:$0xff]   ;;  %v1001_v32 = vld [vmem:[#allocation8 + $0x50] sm:$0xff]  }
  0x4a   :  { %232 = vmatpush1.bf16.msra.mxu1 %v973_v6  ;;  %v986_v28 = vld [vmem:[#allocation5 + $0x8] ss:$16 sps:$4 sm:$0xff]   ;;  %v998_v29 = vld [vmem:[#allocation8 + $0xf8] sm:$0xff]   ;;  %v1005_v36 = vld [vmem:[#allocation8 + $0x48] sm:$0xff]  }
  0x4b   :  { %233 = vmatprep.subr.bf16.mxu1 %v974_v7  ;;  %880 = vmatpush3.bf16.msra.mxu0 %v992_v18  ;;  %v999_v30 = vld [vmem:[#allocation8 + $0x18] sm:$0xff]   ;;  %v1002_v33 = vld [vmem:[#allocation8 + $0xf0] sm:$0xff]   ;;  %v1006_v37 = vld [vmem:[#allocation8 + $0xe8] sm:$0xff]  }
  0x4c   :  { %881 = vmatprep.subr.bf16.mxu0 %v993_v19  ;;  %v1000_v31 = vld [vmem:[#allocation8 + $0xb8] sm:$0xff]   ;;  %v1003_v34 = vld [vmem:[#allocation8 + $0x10] sm:$0xff]   ;;  %v1007_v38 = vld [vmem:[#allocation8 + $0x8] sm:$0xff]  }
  0x4d   :  { %v1004_v35 = vld [vmem:[#allocation8 + $0xb0] sm:$0xff]   ;;  %v1008_v39 = vld [vmem:[#allocation8 + $0xa8] sm:$0xff]   ;;  %v1009_v40 = vld [vmem:[#allocation8 + $0x40] sm:$0xff]  }
  0x4e   :  { %234 = vmatpush1.bf16.msra.mxu1 %v976_v8  ;;  %v1010_v41 = vld [vmem:[#allocation8 + $0xe0] sm:$0xff]   ;;  %v1013_v44 = vld [vmem:[#allocation8 + $0xd8] sm:$0xff]   ;;  %v1015_v46 = vld [vmem:[#allocation8 + $0xd0] sm:$0xff]  }
  0x4f   :  { %270 = vmatprep.subr.bf16.mxu1 %v979_v11  ;;  %882 = vmatpush3.bf16.msra.mxu0 %v994_v22  ;;  %v1011_v42 = vld [vmem:[#allocation8] sm:$0xff]   ;;  %v1014_v45 = vld [vmem:[#allocation8 + $0x98] sm:$0xff]   ;;  %v1016_v47 = vld [vmem:[#allocation8 + $0x90] sm:$0xff]   ;;  %v125_v11 = vsub.s32 2, %v116_v54 }
  0x50   :  { %883 = vmatprep.subr.bf16.mxu0 %v995_v24  ;;  %v1012_v43 = vld [vmem:[#allocation8 + $0xa0] sm:$0xff]   ;;  %v1017_v48 = vld [vmem:[#allocation8 + $0xc8] sm:$0xff]  }
  0x51   :  { %824 = vmatmul.mubr.msk.bf16.vlgmr.msra.gmra.mxu1 %vm215_vm0, %v96_v15  ;;  %v1018_v49 = vld [vmem:[#allocation8 + $0x88] sm:$0xff]   ;;  %v1019_v50 = vld [vmem:[#allocation8 + $0xc0] sm:$0xff]   ;;  %v126_v14 = vrot.slane %v113_v56, %v125_v11 }
  0x52   :  { %271 = vmatpush1.bf16.msra.mxu1 %v977_v13  ;;  %294 = vmatprep.mubr.bf16.mxu1 %v1168_v0  ;;  %v1020_v51 = vld [vmem:[#allocation8 + $0x80] sm:$0xff]   ;;  %v130_v13 = vrot.slane %v113_v56, %v129_v10  ;;  %v859_v56 = vld [vmem:[%s1262_s6] ss:$0 sm:$0xff] }
  0x53   :  { %272 = vmatprep.subr.bf16.mxu1 %v982_v17  ;;  %884 = vmatpush3.bf16.msra.mxu0 %v996_v26 }
  0x54   :  { %885 = vmatprep.subr.bf16.mxu0 %v997_v27 }
  0x56   :  { %273 = vmatpush1.bf16.msra.mxu1 %v980_v20 }
  0x57   :  { %274 = vmatprep.subr.bf16.mxu1 %v985_v21  ;;  %886 = vmatpush3.bf16.msra.mxu0 %v999_v30  ;;  %v1023_v30 = vld [vmem:[#allocation10 + $0x28] sm:$0xff]  }
  0x58   :  { %887 = vmatprep.subr.bf16.mxu0 %v1001_v32  ;;  %v1025_v32 = vld [vmem:[#allocation10 + $0x18] sm:$0xff]  }
  0x5a   :  { %275 = vmatpush1.bf16.msra.mxu1 %v983_v23 }
  0x5b   :  { %276 = vmatprep.subr.bf16.mxu1 %v988_v25  ;;  %888 = vmatpush3.bf16.msra.mxu0 %v1003_v34  ;;  %v1027_v34 = vld [vmem:[#allocation10 + $0x8] sm:$0xff]  }
  0x5c   :  { %889 = vmatprep.subr.bf16.mxu0 %v1005_v36 }
  0x5e   :  { %277 = vmatpush1.bf16.msra.mxu1 %v986_v28  ;;  %v1021_v28 = vld [vmem:[#allocation10 + $0x38] sm:$0xff]  }
  0x5f   :  { %899 = vmatprep.subr.bf16.mxu1 %v998_v29  ;;  %890 = vmatpush3.bf16.msra.mxu0 %v1007_v38  ;;  %v1022_v29 = vld [vmem:[#allocation10 + $0x30] sm:$0xff]  }
  0x60   :  { %891 = vmatprep.subr.bf16.mxu0 %v1009_v40 }
  0x61   :  { %825 = vmatmul.mubr.msk.bf16.vlgmr.msra.gmra.mxu1 %vm215_vm0, %v96_v15 }
  0x62   :  { %900 = vmatpush3.bf16.msra.mxu1 %v1000_v31  ;;  %v1024_v31 = vld [vmem:[#allocation10 + $0x20] sm:$0xff]  }
  0x63   :  { %901 = vmatprep.subr.bf16.mxu1 %v1002_v33  ;;  %892 = vmatpush3.bf16.msra.mxu0 %v1011_v42  ;;  %v1026_v33 = vld [vmem:[#allocation10 + $0x10] sm:$0xff]   ;;  %v826_v42 = vld [vmem:[%s1260_s4] ss:$0 sm:$0xff]  ;;  %s1171_s4 = smov [#allocation11]  }
  0x64   :  { %930 = vmatprep.subr.bf16.mxu0 %v1169_v52  ;;  %s794_s8 = sshll.u32 %s1171_s4, 4  ;;  %s795_s8 = int_to_ptr.vmem [resolvable:$true] %s794_s8 }
  0x65   :  { %s1129_s9 = scalar_lea.vmem %s795_s8, 128  ;;  %p1134_p12 = scmp.lt.s32.totalorder %s795_s8, %s795_s8 }
  0x66   :  { %902 = vmatpush3.bf16.msra.mxu1 %v1004_v35  ;;  %v1028_v35 = vld [vmem:[#allocation10] sm:$0xff]   ;;  %p1130_p11 = scmp.ne.s32.totalorder %s795_s8, %s1129_s9  ;;  %p1135_p13 = scmp.lt.s32.totalorder %s1129_s9, %s1129_s9 }
  0x67   :  { %903 = vmatprep.subr.bf16.mxu1 %v1006_v37 }
  0x68   :  { %p1136_p0 = por %p1135_p13, %p1134_p12 }
  0x6a   :  { %904 = vmatpush3.bf16.msra.mxu1 %v1008_v39  ;;  %p1137_p1 = pnand %p1136_p0, %p1130_p11 }
  0x6b   :  { %905 = vmatprep.subr.bf16.mxu1 %v1010_v41 }
  0x6e   :  { %906 = vmatpush3.bf16.msra.mxu1 %v1012_v43 }
  0x6f   :  { %907 = vmatprep.subr.bf16.mxu1 %v1013_v44 }
  0x72   :  { %908 = vmatpush3.bf16.msra.mxu1 %v1014_v45 }
  0x73   :  { %909 = vmatprep.subr.bf16.mxu1 %v1015_v46 }
  0x76   :  { %910 = vmatpush3.bf16.msra.mxu1 %v1016_v47 }
  0x77   :  { %911 = vmatprep.subr.bf16.mxu1 %v1017_v48 }
  0x7a   :  { %912 = vmatpush3.bf16.msra.mxu1 %v1018_v49 }
  0x7b   :  { %913 = vmatprep.subr.bf16.mxu1 %v1019_v50 }
  0x7e   :  { %914 = vmatpush3.bf16.msra.mxu1 %v1020_v51 }
 0x111   :  { %v253_v58 = vpop.f32.mrf.mxu1 }
 0x112   :  { %v254_v1 = vadd.f32 %v253_v58, %v118_v60 }
 0x113   :  { %v255_v61 = vpop.f32.mrf.mxu1 }
 0x114   :  { %v256_v63 = vadd.f32 %v255_v61, %v122_v59  ;;  %v305_v7 = vmax.f32 %v254_v1, 0.0 }
 0x115   :  { %v257_v62 = vpop.f32.mrf.mxu1 }
 0x116   :  { %v258_v0 = vadd.f32 %v257_v62, %v118_v60  ;;  %v306_v5 = vmax.f32 %v256_v63, 0.0 }
 0x117   :  { %v259_v2 = vpop.f32.mrf.mxu1 }
 0x118   :  { %v260_v3 = vadd.f32 %v259_v2, %v122_v59  ;;  %v309_v4 = vmax.f32 %v258_v0, 0.0 }
 0x11a   :  { %v310_v6 = vmax.f32 %v260_v3, 0.0  ;;  %v313_v9 = vpack.c.bf16 %v309_v4, %v305_v7 }
 0x11c   :  { %v314_v8 = vpack.c.bf16 %v310_v6, %v306_v5 }
 0x11e   :  { %612 = vmatprep.mubr.bf16.mxu0 %v314_v8 }
 0x11f   :  { %613 = vmatmul.mubr.bf16.vlgmr.msra.gmra.mxu0 %v313_v9 }
 0x120   :  { %931 = vmatpush3.bf16.msra.mxu0 %v1021_v28  ;;  %946 = vmatprep.mubr.msk.bf16.mxu0 %vm1170_vm1, %v1169_v52 }
 0x121   :  { %v296_v12 = vpop.f32.mrf.mxu1  ;;  %932 = vmatprep.subr.bf16.mxu0 %v1169_v52 }
 0x122   :  { %v297_v19 = vadd.f32 %v296_v12, %v126_v14 }
 0x123   :  { %v298_v15 = vpop.f32.mrf.mxu1 }
 0x124   :  { %v299_v17 = vadd.f32 %v298_v15, %v130_v13  ;;  %v307_v25 = vmax.f32 %v297_v19, 0.0  ;;  %933 = vmatpush3.bf16.msra.mxu0 %v1022_v29 }
 0x125   :  { %v300_v16 = vpop.f32.mrf.mxu1  ;;  %934 = vmatprep.subr.bf16.mxu0 %v1169_v52 }
 0x126   :  { %v301_v18 = vadd.f32 %v300_v16, %v126_v14  ;;  %v308_v23 = vmax.f32 %v299_v17, 0.0 }
 0x127   :  { %v302_v20 = vpop.f32.mrf.mxu1 }
 0x128   :  { %v303_v21 = vadd.f32 %v302_v20, %v130_v13  ;;  %v311_v22 = vmax.f32 %v301_v18, 0.0  ;;  %935 = vmatpush3.bf16.msra.mxu0 %v1023_v30 }
 0x129   :  { %936 = vmatprep.subr.bf16.mxu0 %v1169_v52 }
 0x12a   :  { %v312_v24 = vmax.f32 %v303_v21, 0.0  ;;  %v315_v27 = vpack.c.bf16 %v311_v22, %v307_v25 }
 0x12c   :  { %v316_v26 = vpack.c.bf16 %v312_v24, %v308_v23  ;;  %937 = vmatpush3.bf16.msra.mxu0 %v1024_v31 }
 0x12d   :  { %938 = vmatprep.subr.bf16.mxu0 %v1169_v52 }
 0x12e   :  { %653 = vmatprep.mubr.bf16.mxu1 %v316_v26 }
 0x12f   :  { %654 = vmatmul.mubr.bf16.vlgmr.msra.gmra.mxu1 %v315_v27 }
 0x130   :  { %939 = vmatpush3.bf16.msra.mxu0 %v1025_v32 }
 0x131   :  { %940 = vmatprep.subr.bf16.mxu0 %v1169_v52 }
 0x134   :  { %941 = vmatpush3.bf16.msra.mxu0 %v1026_v33 }
 0x135   :  { %942 = vmatprep.subr.bf16.mxu0 %v1169_v52 }
 0x138   :  { %943 = vmatpush3.bf16.msra.mxu0 %v1027_v34 }
 0x139   :  { %944 = vmatprep.subr.bf16.mxu0 %v1169_v52 }
 0x13c   :  { %945 = vmatpush3.bf16.msra.mxu0 %v1028_v35 }
 0x1df   :  { %v893_v36 = vpop.f32.mrf.mxu0 }
 0x1e1   :  { %v894_v37 = vpop.f32.mrf.mxu0 }
 0x1e2   :  { %v895_v41 = vadd.f32 %v894_v37, %v893_v36 }
 0x1e3   :  { %v896_v38 = vpop.f32.mrf.mxu0 }
 0x1e4   :  { %v615_v47 = vadd.f32 %v895_v41, %v826_v42 }
 0x1e5   :  { %v897_v39 = vpop.f32.mrf.mxu0 }
 0x1e6   :  { %v898_v44 = vadd.f32 %v897_v39, %v896_v38 }
 0x1e8   :  { %v618_v49 = vadd.f32 %v898_v44, %v826_v42 }
 0x1ef   :  { %v915_v40 = vpop.f32.mrf.mxu1 }
 0x1f1   :  { %v916_v43 = vpop.f32.mrf.mxu1 }
 0x1f2   :  { %v917_v45 = vadd.f32 %v916_v43, %v915_v40 }
 0x1f3   :  { %v918_v46 = vpop.f32.mrf.mxu1 }
 0x1f4   :  { %v656_v50 = vadd.f32 %v917_v45, %v615_v47 }
 0x1f5   :  { %v919_v48 = vpop.f32.mrf.mxu1 }
 0x1f6   :  { %v920_v51 = vadd.f32 %v919_v48, %v918_v46  ;;  %v662_v53 = vmax.f32 %v656_v50, 0.0 }
 0x1f8   :  { %v659_v52 = vadd.f32 %v920_v51, %v618_v49 }
 0x1fa   :  { %v663_v54 = vmax.f32 %v659_v52, 0.0 }
 0x1fc   :  { %v664_v55 = vpack.c.bf16 %v663_v54, %v662_v53 }
 0x1fe   :  { %947 = vmatmul.mubr.bf16.vlgmr.msra.gmra.mxu0 %v664_v55 }
 0x2be   :  { %v770_v57 = vpop.f32.mrf.mxu0 }
 0x2bf   :  { %v771_v59 = vadd.f32 %v859_v56, %v770_v57 }
 0x2c0   :  { %v948_v58 = vpop.f32.mrf.mxu0 }
 0x2c1   :  { %v777_v63 = vmax.f32 %v771_v59, 0.0 }
 0x2c2   :  { %v773_v60 = vpop.f32.mrf.mxu0 }
 0x2c3   :  { %v774_v61 = vadd.f32 %v859_v56, %v773_v60 }
 0x2c4   :  { %v949_v62 = vpop.f32.mrf.mxu0 }
 0x2c5   :  { %v778_v0 = vmax.f32 %v774_v61, 0.0 }
 0x2c7   :  { %v875_v1 = vpack.c.bf16 %v778_v0, %v777_v63 }
 0x2c9   :  { %876 = vst [vmem:[#allocation11] sm:$0xff] %v875_v1  }
 0x2ca   :  { %1140 = shalt.err (!%p1137_p1)
}
 0x2cb   :  { %800 = dma.vmem_to_hbm [thread:$0]  %s795_s8, 128, %s1263_s7, [#allocation4], %s1161_s11, %s1161_s11, %s1162_s12  }
 0x2cc   :  { %1155 = dma.done.wait [#allocation4], 128  }
 0x2cd   :  { %1156 = vsyncadd [#allocation4], 4294967168 }
 0x2ce   :  { %804 = vsyncpa [#allocation3], 1 }
 0x2cf   :  { %805 = vsyncpa [#allocation6], 1 }
 0x2d0   :  { %806 = vsyncpa [#allocation9], 1 }
 0x2d1   :  { %807 = vsyncpa [#allocation4], 1 }

</bundles_post_ra>
